<compile_context>
chip_gen: v7x
topology: tpu7x:2x2x1
jax: 0.10.0
libtpu: 0.0.40
codegen_flags: <defaults>
</compile_context>

<pallas_src>
import functools

import jax
import jax.numpy as jnp
from jax.experimental import pallas as pl
from jax.experimental.pallas import tpu as pltpu


def _layernorm_kernel(x_ref, w_ref, b_ref, o_ref, *, eps: float):
    # x_ref: (row_tile, D) tile of rows; w_ref/b_ref: (1, D) broadcast params.
    x = x_ref[...].astype(jnp.float32)
    inv_d = 1.0 / x.shape[-1]
    # Single fused pass: the two lane (XLU) reductions are independent, so they
    # overlap with the VPU multiply for x*x.
    s1 = jnp.sum(x, axis=-1, keepdims=True)
    s2 = jnp.sum(x * x, axis=-1, keepdims=True)
    mean = s1 * inv_d
    # unbiased=False == divide by D; clamp guards tiny negative values from
    # f32 cancellation in E[x^2] - mean^2.
    var = jnp.maximum(s2 * inv_d - mean * mean, 0.0)
    inv_std = jax.lax.rsqrt(var + eps)          # EUP rsqrt (separate slot)
    w = w_ref[...].astype(jnp.float32)          # cast params once per tile
    b = b_ref[...].astype(jnp.float32)
    o_ref[...] = ((x - mean) * inv_std * w + b).astype(o_ref.dtype)


def _round_up(x: int, m: int) -> int:
    return ((x + m - 1) // m) * m


def _tpu_vmem_capacity_bytes() -> int:
    """Per-TensorCore VMEM capacity; falls back gracefully off-TPU / AOT."""
    try:
        return int(pltpu.get_tpu_info().vmem_capacity_bytes)
    except Exception:
        pass
    try:
        kind = jax.devices()[0].device_kind.lower()
        if "v7" in kind:
            return 64 << 20
    except Exception:
        pass
    return 128 << 20


def _pick_row_tile_and_vmem(rows: int, d_model: int, itemsize: int,
                            row_tile: int | None = None):
    """Pick the row tile and a matching scoped-VMEM limit.

    Working set per tile row:
      2 x (input tile + output tile)  (double-buffered)   -> 4 * itemsize bytes
      ~3 f32 tile-sized intermediates (upcast/centered)   -> 12 bytes
    """
    # Sublane packing: f32 -> 8 rows, bf16 -> 16, int8/fp8 -> 32.
    align = max(8, 32 // max(1, itemsize))

    vmem_cap = _tpu_vmem_capacity_bytes()
    two_tc = vmem_cap <= (64 << 20)  # v7x-class: 64 MiB VMEM/TC, 2 TCs/chip
    if two_tc:
        ws_budget, limit_cap, min_steps = 28 << 20, 44 << 20, 4
    else:
        ws_budget, limit_cap, min_steps = 48 << 20, 64 << 20, 2

    if row_tile is None:
        per_row_bytes = d_model * (4 * itemsize + 3 * 4)
        row_tile = ws_budget // per_row_bytes
        row_tile = min(row_tile, 1024)                       # roofline saturates here
        # Keep >= min_steps grid steps so both TCs get work / DMA overlaps compute.
        row_tile = min(row_tile, _round_up(-(-rows // min_steps), align))
        row_tile = min(row_tile, _round_up(rows, align))     # don't exceed problem
        row_tile = max(align, (row_tile // align) * align)

    # Scoped VMEM: double-buffered in/out + f32 intermediates + params + slack.
    needed = (4 * row_tile * d_model * itemsize
              + 3 * row_tile * d_model * 4
              + 8 * d_model * 4
              + (2 << 20))
    vmem_limit = min(max(_round_up(needed, 1 << 20), 32 << 20), limit_cap)
    return row_tile, vmem_limit


def layer_norm(residual: jax.Array, w: jax.Array, b: jax.Array,
               eps: float = 1e-5, *, row_tile: int | None = None,
               buffers: int | None = None) -> jax.Array:
    """residual: [batch, posn, d_model]; w, b: [d_model]."""
    batch, posn, d_model = residual.shape
    rows = batch * posn
    itemsize = jnp.dtype(residual.dtype).itemsize

    row_tile, vmem_limit = _pick_row_tile_and_vmem(rows, d_model, itemsize, row_tile)

    x2d = residual.reshape(rows, d_model)
    w2d = w.reshape(1, d_model)
    b2d = b.reshape(1, d_model)

    # Ragged last block is handled by Pallas (padded reads, dropped OOB writes);
    # padded rows only produce per-row garbage that is discarded.
    grid = (pl.cdiv(rows, row_tile),)

    if buffers is None:
        x_spec = pl.BlockSpec((row_tile, d_model), lambda i: (i, 0))
        o_spec = pl.BlockSpec((row_tile, d_model), lambda i: (i, 0))
    else:
        # Optional deeper pipelining if profiling shows exposed DMA between steps.
        x_spec = pl.BlockSpec((row_tile, d_model), lambda i: (i, 0),
                              pipeline_mode=pl.Buffered(buffers))
        o_spec = pl.BlockSpec((row_tile, d_model), lambda i: (i, 0),
                              pipeline_mode=pl.Buffered(buffers))

    cost = pl.CostEstimate(
        flops=7 * rows * d_model,
        transcendentals=rows,
        bytes_accessed=(2 * rows * d_model * itemsize
                        + 2 * d_model * jnp.dtype(w.dtype).itemsize),
    )

    out2d = pl.pallas_call(
        functools.partial(_layernorm_kernel, eps=eps),
        out_shape=jax.ShapeDtypeStruct((rows, d_model), residual.dtype),
        grid_spec=pltpu.PrefetchScalarGridSpec(
            num_scalar_prefetch=0,
            grid=grid,
            in_specs=[
                x_spec,
                pl.BlockSpec((1, d_model), lambda i: (0, 0)),   # constant block:
                pl.BlockSpec((1, d_model), lambda i: (0, 0)),   # no re-DMA per step
            ],
            out_specs=o_spec,
        ),
        compiler_params=pltpu.CompilerParams(
            dimension_semantics=("parallel",),
            vmem_limit_bytes=vmem_limit,
        ),
        cost_estimate=cost,
    )(x2d, w2d, b2d)

    return out2d.reshape(batch, posn, d_model)


def layer_norm_ref(residual, w, b, eps=1e-5):
    mean = residual.mean(axis=-1, keepdims=True)
    var = residual.var(axis=-1, keepdims=True)  # ddof=0 == unbiased=False
    normed = (residual - mean) / jnp.sqrt(var + eps)
    return normed * w + b


if __name__ == "__main__":
    eps = 1e-5
    key = jax.random.PRNGKey(0)
    k1, k2, k3, k4 = jax.random.split(key, 4)

    # --- Test 1: module-consistent shapes (Config.d_model = 768), default init.
    batch, posn, d_model = 2, 8, 768
    residual = jax.random.normal(k1, (batch, posn, d_model), dtype=jnp.float32)
    w = jnp.ones((d_model,), dtype=jnp.float32)   # nn.Parameter(t.ones(d_model))
    b = jnp.zeros((d_model,), dtype=jnp.float32)  # nn.Parameter(t.zeros(d_model))

    out = jax.block_until_ready(layer_norm(residual, w, b, eps=eps))
    ref = layer_norm_ref(residual, w, b, eps=eps)
    assert out.shape == (batch, posn, d_model)
    assert jnp.allclose(out, ref, atol=1e-4, rtol=1e-4), "mismatch vs reference (test 1)"

    # --- Test 2: ragged row count (rows not divisible by the tile) + nontrivial
    # affine params, exercising the cdiv/partial-block path.
    batch2, posn2 = 3, 8                          # rows = 24, force row_tile = 16
    residual2 = jax.random.normal(k2, (batch2, posn2, d_model), dtype=jnp.float32)
    w2 = 1.0 + 0.02 * jax.random.normal(k3, (d_model,), dtype=jnp.float32)
    b2 = 0.02 * jax.random.normal(k4, (d_model,), dtype=jnp.float32)

    out2 = jax.block_until_ready(layer_norm(residual2, w2, b2, eps=eps, row_tile=16))
    ref2 = layer_norm_ref(residual2, w2, b2, eps=eps)
    assert out2.shape == (batch2, posn2, d_model)
    assert jnp.allclose(out2, ref2, atol=1e-4, rtol=1e-4), "mismatch vs reference (test 2)"

    print("KERNEL_OK")
</pallas_src>

<mosaic_0001>
module attributes {stable_mosaic.version = 11 : i64} {
  func.func @_layernorm_kernel(%arg0: i32, %arg1: memref<8x768xf32, #tpu.memory_space<vmem>>, %arg2: memref<1x768xf32, #tpu.memory_space<vmem>>, %arg3: memref<1x768xf32, #tpu.memory_space<vmem>>, %arg4: memref<8x768xf32, #tpu.memory_space<vmem>>) attributes {dimension_semantics = [#tpu.dimension_semantics<parallel>], iteration_bounds = array<i64: 2>, scalar_prefetch = 0 : i64, scratch_operands = 0 : i64, tpu.core_type = #tpu.core_type<tc>, window_params = [{transform_indices = @transform_0, window_bounds = array<i64: 8, 768>}, {pipeline_mode = #tpu.pipeline_mode<synchronous>, transform_indices = @transform_1, window_bounds = array<i64: 1, 768>}, {pipeline_mode = #tpu.pipeline_mode<synchronous>, transform_indices = @transform_2, window_bounds = array<i64: 1, 768>}, {transform_indices = @transform_3, window_bounds = array<i64: 8, 768>}]} {
    %c0 = arith.constant 0 : index
    %c0_0 = arith.constant 0 : index
    %0 = vector.load %arg1[%c0, %c0_0] : memref<8x768xf32, #tpu.memory_space<vmem>>, vector<8x768xf32>
    %cst = arith.constant dense<0.000000e+00> : vector<8xf32>
    %1 = vector.multi_reduction <add>, %0, %cst [1] : vector<8x768xf32> to vector<8xf32>
    %2 = vector.shape_cast %1 : vector<8xf32> to vector<8x1xf32>
    %3 = arith.mulf %0, %0 : vector<8x768xf32>
    %cst_1 = arith.constant dense<0.000000e+00> : vector<8xf32>
    %4 = vector.multi_reduction <add>, %3, %cst_1 [1] : vector<8x768xf32> to vector<8xf32>
    %5 = vector.shape_cast %4 : vector<8xf32> to vector<8x1xf32>
    %cst_2 = arith.constant 0.00130208337 : f32
    %6 = vector.broadcast %cst_2 : f32 to vector<8x1xf32>
    %7 = arith.mulf %2, %6 : vector<8x1xf32>
    %cst_3 = arith.constant 0.00130208337 : f32
    %8 = vector.broadcast %cst_3 : f32 to vector<8x1xf32>
    %9 = arith.mulf %5, %8 : vector<8x1xf32>
    %10 = arith.mulf %7, %7 : vector<8x1xf32>
    %11 = arith.subf %9, %10 : vector<8x1xf32>
    %cst_4 = arith.constant 0.000000e+00 : f32
    %12 = vector.broadcast %cst_4 : f32 to vector<8x1xf32>
    %13 = arith.maximumf %11, %12 : vector<8x1xf32>
    %cst_5 = arith.constant 9.99999974E-6 : f32
    %14 = vector.broadcast %cst_5 : f32 to vector<8x1xf32>
    %15 = arith.addf %13, %14 : vector<8x1xf32>
    %16 = math.rsqrt %15 : vector<8x1xf32>
    %c0_6 = arith.constant 0 : index
    %c0_7 = arith.constant 0 : index
    %17 = vector.load %arg2[%c0_6, %c0_7] : memref<1x768xf32, #tpu.memory_space<vmem>>, vector<1x768xf32>
    %c0_8 = arith.constant 0 : index
    %c0_9 = arith.constant 0 : index
    %18 = vector.load %arg3[%c0_8, %c0_9] : memref<1x768xf32, #tpu.memory_space<vmem>>, vector<1x768xf32>
    %19 = vector.broadcast %7 : vector<8x1xf32> to vector<8x768xf32>
    %20 = arith.subf %0, %19 : vector<8x768xf32>
    %21 = vector.broadcast %16 : vector<8x1xf32> to vector<8x768xf32>
    %22 = arith.mulf %20, %21 : vector<8x768xf32>
    %23 = vector.broadcast %17 : vector<1x768xf32> to vector<8x768xf32>
    %24 = arith.mulf %22, %23 : vector<8x768xf32>
    %25 = vector.broadcast %18 : vector<1x768xf32> to vector<8x768xf32>
    %26 = arith.addf %24, %25 : vector<8x768xf32>
    %c0_10 = arith.constant 0 : index
    %c0_11 = arith.constant 0 : index
    %27 = vector.load %arg4[%c0_10, %c0_11] : memref<8x768xf32, #tpu.memory_space<vmem>>, vector<8x768xf32>
    tpu.vector_store %arg4[%c0_10, %c0_11], %26 {strides = array<i32>} : memref<8x768xf32, #tpu.memory_space<vmem>>, vector<8x768xf32>,
    return
  }
  func.func @transform_0(%arg0: i32) -> (i32, i32) {
    %c0_i32 = arith.constant 0 : i32
    %c0_i32_0 = arith.constant 0 : i32
    return %arg0, %c0_i32 : i32, i32
  }
  func.func @transform_1(%arg0: i32) -> (i32, i32) {
    %c0_i32 = arith.constant 0 : i32
    %c0_i32_0 = arith.constant 0 : i32
    %c0_i32_1 = arith.constant 0 : i32
    return %c0_i32, %c0_i32_0 : i32, i32
  }
  func.func @transform_2(%arg0: i32) -> (i32, i32) {
    %c0_i32 = arith.constant 0 : i32
    %c0_i32_0 = arith.constant 0 : i32
    %c0_i32_1 = arith.constant 0 : i32
    return %c0_i32, %c0_i32_0 : i32, i32
  }
  func.func @transform_3(%arg0: i32) -> (i32, i32) {
    %c0_i32 = arith.constant 0 : i32
    %c0_i32_0 = arith.constant 0 : i32
    return %arg0, %c0_i32 : i32, i32
  }
}

</mosaic_0001>

<bundles_post_ra>
// kernel: tpu_custom_call.1
= control target key start
LH: loop header
LB: loop body
LE: loop exit
PB: predicated region body
PF: predicated region fallthrough
CT: control target
= control target key end

     0   :  { %8 = vsyncpa [#allocation3], 0  ;;  %s856_s0 = inlined_call_operand.hbm [shape: f32[16,768], index: 0, kind: input, shape index: {}]   ;;  %s857_s1 = inlined_call_operand.hbm [shape: f32[1,768], index: 1, kind: input, shape index: {}]   ;;  %s858_s2 = inlined_call_operand.vmem [shape: f32[1,768], index: 2, kind: input, shape index: {}]   ;;  %s859_s3 = inlined_call_operand.hbm [shape: f32[16,768], index: 3, kind: output, shape index: {}]  }
   0x1   :  { %10 = vsyncpa [#allocation3 + $0x1], 0 }
   0x2   :  { %11 = vsyncpa [#allocation6], 0 }
   0x3   :  { %12 = vsyncpa [#allocation4], 0 }
   0x4   :  { %14 = vsyncpa [#allocation4 + $0x1], 0  ;;  %s648_s12 = smov 0   ;;  %s650_s13 = smov 0  }
   0x5   :  { %s652_s14 = smov 0   ;;  %s654_s15 = smov 0  }
   0x6 LB: > { %s669_s16 = sadd.s32 4294967295, %s623_s15   ;;  %s422_s17 = sadd.s32 4294967294, %s623_s15   ;;  %s623_s15 = sphi %s654_s15, %s883_s15   ;;  %s619_s14 = sphi %s652_s14, %s882_s14   ;;  %s615_s13 = sphi %s650_s13, %s881_s13   ;;  %s611_s12 = sphi %s648_s12, %s880_s12  }
   0x7   : > { %p40_p0 = scmp.ne.s32.totalorder %s615_s13, %s611_s12  ;;  %p860_p1 = scmp.eq.s32.totalorder %s669_s16, 0 }
   0x8   : > { %p112_p3 = scmp.eq.s32.totalorder %s422_s17, 1  ;;  %p423_p5 = scmp.ge.s32.totalorder %s623_s15, 1 }
   0x9   : > { %p678_p4 = por %p860_p1, %p40_p0  ;;  %p119_p7 = scmp.lt.s32.totalorder %s623_s15, 3 }
   0xa   : > { %p683_p6 = por %p112_p3, %p40_p0  ;;  %s625_s21 = smov [#allocation5]  }
   0xb   : > { %s863_s18 = scalar_select %p678_p4, 1, 0 }
   0xc   : > { %s864_s19 = scalar_select %p683_p6, 1, 0 }
   0xd   : > { %p688_p8 = pnand %p423_p5, %p119_p7  ;;  %s132_s22 = sshll.u32 %s625_s21, 4  ;;  %s133_s22 = int_to_ptr.vmem [resolvable:$true] %s132_s22 }
   0xe   : > { %s696_s23 = sadd.s32 1, %s623_s15   ;;  %s27_s27 = sadd.s32 1, %s619_s14 }
   0xf   : > { %s865_s20 = scalar_select %p688_p8, 1, 0 }
  0x10   : > { %p444_p10 = pneg %p688_p8  ;;  %s24_s25 = ssub.s32 %s623_s15, %s696_s23 }
  0x11   : > { %p706_p12 = scmp.eq.s32.totalorder %s24_s25, 0  ;;  %s495_s30 = scalar_lea.hbm %s857_s1, 96 }
  0x12   : > { %p700_p11 = pnand %p444_p10, %p860_p1  ;;  %p496_p0 = scmp.ne.s32.totalorder %s857_s1, %s495_s30 }
  0x13   : > { %s867_s26 = scalar_select %p706_p12, 1, 0 }
  0x14   : > { %p497_p3 = pneg %p700_p11  ;;  %p502_p10 = scmp.lt.u32.totalorder %s495_s30, %s857_s1 }
  0x16   : > { %p498_p5 = pnand %p497_p3, %p496_p0 }
  0x18   : > { %p499_p7 = pneg %p498_p5 }
  0x1a   : > { %p504_p9 = pnand %p502_p10, %p499_p7 }
  0x1c   : > { %507 = shalt.err (!%p504_p9)
}
  0x1d   : > { %s508_s8 = scalar_lea.vmem %s133_s22, 96  ;;  %p516_p6 = scmp.lt.s32.totalorder %s133_s22, %s133_s22 }
  0x1e   : > { %p509_p1 = scmp.ne.s32.totalorder %s133_s22, %s508_s8  ;;  %p517_p4 = scmp.lt.s32.totalorder %s508_s8, %s508_s8 }
  0x20   : > { %p511_p2 = pnand %p509_p1, %p497_p3  ;;  %p518_p8 = por %p517_p4, %p516_p6 }
  0x22   : > { %p512_p13 = pneg %p511_p2 }
  0x24   : > { %p519_p12 = pnand %p518_p8, %p512_p13 }
  0x26   : > { %522 = shalt.err (!%p519_p12)
}
  0x27   : > { %447 = dma.hbm_to_vmem [thread:$0]  (!%p700_p11), %s857_s1, 96, %s133_s22, [#allocation6]  }
  0x28   : > { %p868_p1 = scmp.ne.s32.totalorder %s867_s26, 0  ;;  %p35_p2 = scmp.eq.s32.totalorder %s623_s15, 0 }
  0x29   : > { %p869_p4 = scmp.ne.s32.totalorder %s619_s14, %s615_s13  ;;  %p870_p6 = scmp.eq.s32.totalorder %s669_s16, 1 }
  0x2a   : > { %s732_s11 = scalar_select %p868_p1, %s619_s14, %s27_s27  }
  0x2b   : > { %p740_p8 = por %p870_p6, %p869_p4  ;;  %p457_p9 = scmp.lt.s32.totalorder %s623_s15, 2 }
  0x2c   : > { %s146_s21 = sand.u32 1, %s619_s14   ;;  %p872_p12 = pmov %p869_p4 }
  0x2d   : > { %s432_s24 = smul.u32 48, %s146_s21  ;;  %s147_s4 = scalar_lea.sflag [#allocation3], %s146_s21 }
  0x2e   : > { %p36_p13 = por %p35_p2, %p872_p12  ;;  %s433_s25 = smul.u32 768, %s623_s15 }
  0x2f   : > { %s150_s29 = scalar_lea.vmem [#allocation2], %s432_s24  ;;  %s528_s8 = scalar_lea.hbm %s856_s0, 1536 }
  0x30   : > { %p750_p0 = pnand %p457_p9, %p36_p13  ;;  %s757_s27 = scalar_lea.hbm %s856_s0, %s433_s25 }
  0x31   : > { %s158_s30 = sshll.u32 %s150_s29, 4  ;;  %s523_s5 = scalar_lea.hbm %s757_s27, 768  ;;  %s759_s30 = int_to_ptr.vmem [resolvable:$true] %s158_s30 }
  0x32   : > { %p524_p11 = scmp.ne.s32.totalorder %s757_s27, %s523_s5  ;;  %p525_p3 = pneg %p750_p0 }
  0x33   : > { %p529_p10 = scmp.lt.u32.totalorder %s757_s27, %s856_s0  ;;  %p530_p1 = scmp.lt.u32.totalorder %s528_s8, %s523_s5 }
  0x34   : > { %p526_p5 = pnand %p525_p3, %p524_p11  ;;  %p532_p4 = scmp.lt.u32.totalorder %s523_s5, %s757_s27 }
  0x35   : > { %p531_p2 = por %p530_p1, %p529_p10 }
  0x36   : > { %p527_p7 = pneg %p526_p5 }
  0x37   : > { %p533_p6 = por %p532_p4, %p531_p2 }
  0x39   : > { %p534_p9 = pnand %p533_p6, %p527_p7 }
  0x3b   : > { %537 = shalt.err (!%p534_p9)
}
  0x3c   : > { %s538_s21 = scalar_lea.vmem %s759_s30, 768  ;;  %s626_s24 = smov [#allocation2]  }
  0x3d   : > { %p539_p12 = scmp.ne.s32.totalorder %s759_s30, %s538_s21  ;;  %s543_s25 = sshll.u32 %s626_s24, 4  ;;  %s544_s25 = int_to_ptr.vmem [resolvable:$false] %s543_s25 }
  0x3e   : > { %s545_s22 = scalar_lea.vmem %s544_s25, 1536  ;;  %p546_p5 = scmp.lt.s32.totalorder %s759_s30, %s544_s25 }
  0x3f   : > { %p541_p13 = pnand %p539_p12, %p525_p3  ;;  %p547_p10 = scmp.lt.s32.totalorder %s545_s22, %s538_s21 }
  0x41   : > { %p542_p11 = pneg %p541_p13  ;;  %p548_p1 = por %p547_p10, %p546_p5 }
  0x43   : > { %p549_p2 = pnand %p548_p1, %p542_p11 }
  0x45   : > { %552 = shalt.err (!%p549_p2)
}
  0x46   : > { %451 = dma.hbm_to_vmem [thread:$0]  (!%p750_p0), %s757_s27, 768, %s759_s30, %s147_s4  }
  0x47   : > { %p874_p7 = scmp.ne.s32.totalorder %s865_s20, 0 }
  0x48   : > { %s789_s26 = sand.u32 (!%p874_p7), 1, %s615_s13   ;;  %p875_p3 = scmp.ne.s32.totalorder (!%p874_p7), %s863_s18, 0 }
  0x49   : > { %167 = sbr.rel (%p874_p7) target bundleno = 282 (0x11a), region = 32  ;;  %s170_s5 = scalar_lea.sflag (!%p874_p7), [#allocation3], %s789_s26 }
  0x4a   : > { %s434_s29 = smul.u32 (!%p874_p7), 48, %s789_s26 }
  0x4c   : > { %s173_s6 = scalar_lea.vmem (!%p874_p7), [#allocation2], %s434_s29 }
  0x50   : > { %598 = dma.done.wait (%p875_p3), %s170_s5, 768  }
  0x51   : > { %600 = vsyncadd (%p875_p3), %s170_s5, 4294966528  ;;  %p876_p0 = scmp.eq.s32.totalorder %s669_s16, 0 }
  0x53   : > { %602 = dma.done.wait (%p876_p0), [#allocation6], 96   ;;  %p877_p4 = pmov %p876_p0 }
  0x54   : > { %v200_v0 = vld [vmem:[%s173_s6] sm:$0xff]  ;;  %v201_v1 = vld [vmem:[%s173_s6 + $0x8] sm:$0xff]  ;;  %v202_v2 = vld [vmem:[%s173_s6 + $0x10] sm:$0xff]  ;;  %v248_v28 = vlaneseq  ;;  %s435_s28 = smul.u32 768, %s669_s16  ;;  %s199_s27 = scalar_lea.vmem [#allocation7], %s434_s29 }
  0x55   : > { %604 = vsyncadd (%p877_p4), [#allocation6], 4294967200  ;;  %v206_v3 = vadd.f32 %v201_v1, %v200_v0  ;;  %v213_v4 = vmul.f32 %v200_v0, %v200_v0  ;;  %v214_v5 = vmul.f32 %v201_v1, %v201_v1  ;;  %v215_v6 = vmul.f32 %v202_v2, %v202_v2  ;;  %v203_v7 = vld [vmem:[%s173_s6 + $0x18] sm:$0xff]  ;;  %v204_v11 = vld [vmem:[%s173_s6 + $0x20] sm:$0xff]  ;;  %s342_s30 = sshll.u32 %s199_s27, 4  ;;  %s328_s8 = scalar_lea.sflag [#allocation4], %s789_s26  ;;  %s814_s30 = int_to_ptr.vmem [resolvable:$true] %s342_s30 }
  0x56   : > { %v216_v9 = vmul.f32 %v203_v7, %v203_v7  ;;  %v217_v13 = vmul.f32 %v204_v11, %v204_v11  ;;  %v205_v15 = vld [vmem:[%s173_s6 + $0x28] sm:$0xff]  ;;  %v249_v31 = vshrl.u32 %v248_v28, 7  ;;  %v233_v36 = vld [vmem:[#allocation5] sm:$0x3f]  ;;  %s812_s16 = scalar_lea.hbm %s859_s3, %s435_s28  ;;  %s553_s9 = scalar_lea.vmem %s814_s30, 768 }
  0x57   : > { %v207_v8 = vadd.f32 %v206_v3, %v202_v2  ;;  %v219_v10 = vadd.f32 %v214_v5, %v213_v4  ;;  %v218_v17 = vmul.f32 %v205_v15, %v205_v15  ;;  %v234_v39 = vld [vmem:[%s858_s2] sm:$0x3f]  ;;  %p554_p6 = scmp.ne.s32.totalorder %s814_s30, %s553_s9  ;;  %s627_s10 = smov [#allocation7]  }
  0x58   : > { %v250_v32 = vsub.s32 0, %v249_v31  ;;  %v254_v33 = vsub.s32 1, %v249_v31  ;;  %v258_v34 = vsub.s32 2, %v249_v31  ;;  %v262_v35 = vsub.s32 3, %v249_v31  ;;  %s557_s21 = sshll.u32 %s627_s10, 4  ;;  %s558_s21 = int_to_ptr.vmem [resolvable:$false] %s557_s21 }
  0x59   : > { %v208_v12 = vadd.f32 %v207_v8, %v203_v7  ;;  %v220_v14 = vadd.f32 %v219_v10, %v215_v6  ;;  %v266_v37 = vsub.s32 4, %v249_v31  ;;  %v270_v38 = vsub.s32 5, %v249_v31  ;;  %p555_p9 = pnand %p554_p6, %p740_p8  ;;  %s559_s24 = scalar_lea.vmem %s558_s21, 1536 }
  0x5a   : > { %v251_v40 = vrot.slane %v233_v36, %v250_v32  ;;  %v255_v41 = vrot.slane %v233_v36, %v254_v33  ;;  %v259_v42 = vrot.slane %v233_v36, %v258_v34  ;;  %v263_v43 = vrot.slane %v233_v36, %v262_v35  ;;  %p560_p13 = scmp.lt.s32.totalorder %s814_s30, %s558_s21  ;;  %p561_p11 = scmp.lt.s32.totalorder %s559_s24, %s553_s9 }
  0x5b   : > { %v209_v16 = vadd.f32 %v208_v12, %v204_v11  ;;  %v221_v18 = vadd.f32 %v220_v14, %v216_v9  ;;  %v267_v44 = vrot.slane %v233_v36, %v266_v37  ;;  %v271_v45 = vrot.slane %v233_v36, %v270_v38  ;;  %p556_p12 = pneg %p555_p9 }
  0x5c   : > { %v288_v46 = vrot.slane %v234_v39, %v250_v32  ;;  %v292_v47 = vrot.slane %v234_v39, %v254_v33  ;;  %v296_v55 = vrot.slane %v234_v39, %v258_v34  ;;  %v300_v56 = vrot.slane %v234_v39, %v262_v35  ;;  %p562_p5 = por %p561_p11, %p560_p13 }
  0x5d   : > { %v210_v19 = vadd.f32 %v209_v16, %v205_v15  ;;  %v222_v20 = vadd.f32 %v221_v18, %v217_v13  ;;  %v304_v63 = vrot.slane %v234_v39, %v266_v37  ;;  %v308_v3 = vrot.slane %v234_v39, %v270_v38 }
  0x5e   : > { %p563_p10 = pnand %p562_p5, %p556_p12 }
  0x5f   : > { %211 = vadd.xlane.f32.xlu0 %v210_v19  ;;  %v223_v21 = vadd.f32 %v222_v20, %v218_v17 }
  0x63   : > { %224 = vadd.xlane.f32.xlu0 %v223_v21 }
  0xec   : > { %v212_v22 = vpop.xlane.xlu0 %211 }
  0xed   : > { %v226_v23 = vmul.f32 0.0013020834, %v212_v22 }
  0xef   : > { %v228_v25 = vmul.f32 %v226_v23, %v226_v23  ;;  %v235_v48 = vsub.f32 %v200_v0, %v226_v23  ;;  %v236_v49 = vsub.f32 %v201_v1, %v226_v23  ;;  %v237_v50 = vsub.f32 %v202_v2, %v226_v23 }
  0xf0   : > { %v225_v24 = vpop.xlane.xlu0 %224  ;;  %v238_v51 = vsub.f32 %v203_v7, %v226_v23  ;;  %v239_v53 = vsub.f32 %v204_v11, %v226_v23  ;;  %v240_v54 = vsub.f32 %v205_v15, %v226_v23 }
  0xf1   : > { %v227_v26 = vmul.f32 0.0013020834, %v225_v24 }
  0xf3   : > { %v229_v27 = vsub.f32 %v227_v26, %v228_v25 }
  0xf5   : > { %v230_v29 = vmax.f32 %v229_v27, 0.0 }
  0xf7   : > { %v231_v30 = vadd.f32 1e-05, %v230_v29 }
  0xf9   : > { %493 = vrsqrt.f32 %v231_v30 }
 0x103   : > { %v494_v52 = vpop.eup %493 }
 0x104   : > { %v241_v57 = vmul.f32 %v494_v52, %v235_v48  ;;  %v242_v58 = vmul.f32 %v494_v52, %v236_v49  ;;  %v243_v59 = vmul.f32 %v494_v52, %v237_v50  ;;  %v244_v60 = vmul.f32 %v494_v52, %v238_v51 }
 0x105   : > { %v245_v61 = vmul.f32 %v494_v52, %v239_v53  ;;  %v246_v62 = vmul.f32 %v494_v52, %v240_v54 }
 0x106   : > { %v278_v0 = vmul.f32 %v251_v40, %v241_v57  ;;  %v279_v1 = vmul.f32 %v255_v41, %v242_v58  ;;  %v280_v4 = vmul.f32 %v259_v42, %v243_v59  ;;  %v281_v2 = vmul.f32 %v263_v43, %v244_v60 }
 0x107   : > { %v282_v5 = vmul.f32 %v267_v44, %v245_v61  ;;  %v283_v6 = vmul.f32 %v271_v45, %v246_v62 }
 0x108   : > { %v315_v7 = vadd.f32 %v288_v46, %v278_v0  ;;  %v316_v8 = vadd.f32 %v292_v47, %v279_v1  ;;  %v317_v9 = vadd.f32 %v296_v55, %v280_v4  ;;  %v318_v10 = vadd.f32 %v300_v56, %v281_v2 }
 0x109   : > { %v319_v11 = vadd.f32 %v304_v63, %v282_v5  ;;  %v320_v12 = vadd.f32 %v308_v3, %v283_v6 }
 0x10a   : > { %321 = vst [vmem:[%s199_s27] sm:$0xff] %v315_v7  ;;  %322 = vst [vmem:[%s199_s27 + $0x8] sm:$0xff] %v316_v8 }
 0x10b   : > { %323 = vst [vmem:[%s199_s27 + $0x10] sm:$0xff] %v317_v9  ;;  %324 = vst [vmem:[%s199_s27 + $0x18] sm:$0xff] %v318_v10 }
 0x10c   : > { %325 = vst [vmem:[%s199_s27 + $0x20] sm:$0xff] %v319_v11  ;;  %326 = vst [vmem:[%s199_s27 + $0x28] sm:$0xff] %v320_v12 }
 0x10d   : > { %566 = shalt.err (!%p563_p10)
}
 0x10e   : > { %s567_s25 = scalar_lea.hbm %s812_s16, 768  ;;  %s571_s29 = scalar_lea.hbm %s859_s3, 1536 }
 0x10f   : > { %p568_p1 = scmp.ne.s32.totalorder %s812_s16, %s567_s25  ;;  %p572_p3 = scmp.lt.u32.totalorder %s812_s16, %s859_s3 }
 0x110   : > { %p573_p0 = scmp.lt.u32.totalorder %s571_s29, %s567_s25  ;;  %p575_p6 = scmp.lt.u32.totalorder %s567_s25, %s812_s16 }
 0x111   : > { %p569_p2 = pnand %p568_p1, %p740_p8 }
 0x112   : > { %p574_p4 = por %p573_p0, %p572_p3 }
 0x113   : > { %p570_p7 = pneg %p569_p2 }
 0x114   : > { %p576_p9 = por %p575_p6, %p574_p4 }
 0x116   : > { %p577_p12 = pnand %p576_p9, %p570_p7 }
 0x118   : > { %580 = shalt.err (!%p577_p12)
}
 0x119   : > { %442 = dma.vmem_to_hbm [thread:$0]  (%p740_p8), %s814_s30, 768, %s812_s16, %s328_s8  }
 0x11a PF: > { %s354_s18 = sand.u32 1, %s611_s12   ;;  %p878_p13 = scmp.ne.s32.totalorder %s864_s19, 0 }
 0x11b   : > { %p879_p11 = scmp.ge.s32.totalorder %s623_s15, 2  ;;  %s355_s20 = scalar_lea.sflag [#allocation4], %s354_s18 }
 0x11d   : > { %p453_p5 = pnand %p879_p11, %p878_p13 }
 0x11f   : > { %606 = dma.done.wait (!%p453_p5), %s355_s20, 768  }
 0x120   : > { %608 = vsyncadd (!%p453_p5), %s355_s20, 4294966528  ;;  %p17_p10 = scmp.ge.s32.totalorder %s696_s23, 4   ;;  %s880_s12 = smov %s615_s13 }
 0x121   : > { %s881_s13 = smov %s619_s14  ;;  %s882_s14 = smov %s732_s11 }
 0x122   : > { %s883_s15 = smov %s696_s23  ;;  %19 = sbr.rel (!%p17_p10) target bundleno = 6 (0x6), region = 81 }
 0x129   :  { %360 = vsyncpa [#allocation3], 1 }
 0x12a   :  { %362 = vsyncpa [#allocation3 + $0x1], 1 }
 0x12b   :  { %363 = vsyncpa [#allocation6], 1 }
 0x12c   :  { %364 = vsyncpa [#allocation4], 1 }
 0x12d   :  { %366 = vsyncpa [#allocation4 + $0x1], 1 }

</bundles_post_ra>
